<compile_context>
chip_gen: v6e
topology: v6e:2x2x1
jax: 0.10.0
libtpu: 0.0.40
codegen_flags: <defaults>
</compile_context>

<pallas_src>
import jax
import jax.numpy as jnp
from jax.experimental import pallas as pl
from jax.experimental.pallas import tpu as pltpu

LANE = 128


def _pad_lanes(w):
    return ((w + LANE - 1) // LANE) * LANE


def _make_catter_kernel(widths):
    """Build a kernel specialized to the (static) input widths.

    Plan: each 128-aligned (offset and width) input gets a direct slice
    store; consecutive non-aligned inputs are grouped, concatenated in
    registers and stored once at the group's start offset.
    """
    offsets = []
    off = 0
    for w in widths:
        offsets.append(off)
        off += w

    plan = []  # (start_offset, tuple(input indices))
    i, n = 0, len(widths)
    while i < n:
        if offsets[i] % LANE == 0 and widths[i] % LANE == 0:
            plan.append((offsets[i], (i,)))
            i += 1
        else:
            j = i
            while j < n and not (offsets[j] % LANE == 0 and widths[j] % LANE == 0):
                j += 1
            plan.append((offsets[i], tuple(range(i, j))))
            i = j

    def kernel(*refs):
        *in_refs, out_ref = refs
        for start, idxs in plan:
            if len(idxs) == 1:
                k = idxs[0]
                out_ref[:, start:start + widths[k]] = in_refs[k][...]
            else:
                w = sum(widths[k] for k in idxs)
                out_ref[:, start:start + w] = jnp.concatenate(
                    [in_refs[k][...] for k in idxs], axis=-1)

    return kernel


def _choose_tile_rows(rows, widths, itemsize, ws_budget):
    """Byte-based row-tile sizing using the lane-padded VMEM footprint."""
    padded_in = sum(_pad_lanes(w) for w in widths)
    padded_out = _pad_lanes(sum(widths))

    # Double-buffered inputs + double-buffered output + one concat temp.
    per_row = itemsize * (2 * padded_in + 2 * padded_out + padded_out)
    max_rows_budget = max(8, ws_budget // per_row)

    # Target ~4 MiB per lane-padded output block (amortizes ~0.35us/step),
    # but never below 512 rows (HBM roofline knee from tile sweeps).
    target_rows = max(512, (4 << 20) // (itemsize * padded_out))

    # Dtype-aware sublane multiple: 8 for f32, 16 for bf16, 32 for int8/fp8.
    sublane = 8 * max(1, 4 // itemsize)

    tile = min(rows, target_rows, max_rows_budget)

    # Guarantee >=2 grid steps when rows allow, so both v7x TensorCores get
    # work (neutral on 1-TC v5e/v6e: one extra ~0.35us step).
    if rows >= 2 * sublane:
        tile = min(tile, rows // 2)

    if tile >= sublane:
        tile = (tile // sublane) * sublane
    else:
        tile = rows  # tiny inputs: block == full extent
    return tile, per_row


def catter(xs):
    """Concatenate a list/tuple of arrays along the last dim via a Pallas kernel."""
    xs = list(xs)
    assert len(xs) >= 1
    lead = xs[0].shape[:-1]
    dtype = xs[0].dtype
    for x in xs:
        assert x.shape[:-1] == lead, "all inputs must match on leading dims"
        assert x.dtype == dtype, "all inputs must share a dtype"

    widths_all = [int(x.shape[-1]) for x in xs]
    total_last = sum(widths_all)

    # Zero-width inputs contribute nothing; drop them (invalid BlockSpec guard).
    pairs = [(x, w) for x, w in zip(xs, widths_all) if w > 0]
    if not pairs:
        return jnp.zeros(lead + (0,), dtype=dtype)
    xs, widths = [p[0] for p in pairs], [p[1] for p in pairs]

    rows = 1
    for d in lead:
        rows *= int(d)

    xs2d = [x.reshape(rows, w) for x, w in zip(xs, widths)]
    itemsize = jnp.dtype(dtype).itemsize

    # Generation-aware VMEM budgets (v7x: 64 MiB physical; v5e/v6e: 128 MiB).
    try:
        vmem_cap = int(pltpu.get_tpu_info().vmem_capacity_bytes)
    except Exception:
        vmem_cap = 64 << 20  # conservative fallback
    if vmem_cap <= (64 << 20):          # v7x-class
        ws_budget, vmem_limit_cap = 16 << 20, 36 << 20
    else:                               # v5e / v6e
        ws_budget, vmem_limit_cap = 40 << 20, 64 << 20

    tile_r, per_row = _choose_tile_rows(rows, widths, itemsize, ws_budget)
    grid = (pl.cdiv(rows, tile_r),)

    needed = tile_r * per_row
    vmem_limit = int(min(max(needed + (8 << 20), 16 << 20), vmem_limit_cap))

    in_specs = [pl.BlockSpec((tile_r, w), lambda r: (r, 0)) for w in widths]
    out_specs = pl.BlockSpec((tile_r, total_last), lambda r: (r, 0))

    out2d = pl.pallas_call(
        _make_catter_kernel(widths),
        out_shape=jax.ShapeDtypeStruct((rows, total_last), dtype),
        grid=grid,
        in_specs=in_specs,
        out_specs=out_specs,
        compiler_params=pltpu.CompilerParams(
            dimension_semantics=("parallel",),
            vmem_limit_bytes=vmem_limit,
        ),
    )(*xs2d)

    return out2d.reshape(lead + (total_last,))


if __name__ == "__main__":
    key = jax.random.PRNGKey(0)
    k1, k2, k3, k4, k5 = jax.random.split(key, 5)

    # Case 1: narrow, non-lane-aligned last dims (concat path), f32.
    x1 = jax.random.normal(k1, (2, 4, 16, 16), dtype=jnp.float32)
    x2 = jax.random.normal(k2, (2, 4, 16, 8), dtype=jnp.float32)
    x3 = jax.random.normal(k3, (2, 4, 16, 32), dtype=jnp.float32)
    out = jax.block_until_ready(catter([x1, x2, x3]))
    ref = jnp.concatenate([x1, x2, x3], axis=-1)
    assert out.shape == ref.shape, (out.shape, ref.shape)
    assert jnp.array_equal(out, ref), "mismatch vs jnp.concatenate (f32 case)"

    # Case 2: lane-aligned leading input + narrow tail, bf16 (direct-store
    # path + dtype-aware sublane rounding).
    y1 = jax.random.normal(k4, (2, 4, 16, 128), dtype=jnp.bfloat16)
    y2 = jax.random.normal(k5, (2, 4, 16, 16), dtype=jnp.bfloat16)
    out2 = jax.block_until_ready(catter([y1, y2]))
    ref2 = jnp.concatenate([y1, y2], axis=-1)
    assert out2.shape == ref2.shape, (out2.shape, ref2.shape)
    assert jnp.array_equal(out2, ref2), "mismatch vs jnp.concatenate (bf16 case)"

    print("KERNEL_OK")
</pallas_src>

<mosaic_0001>
module attributes {stable_mosaic.version = 11 : i64} {
  func.func @kernel(%arg0: i32, %arg1: memref<64x16xf32, #tpu.memory_space<vmem>>, %arg2: memref<64x8xf32, #tpu.memory_space<vmem>>, %arg3: memref<64x32xf32, #tpu.memory_space<vmem>>, %arg4: memref<64x56xf32, #tpu.memory_space<vmem>>) attributes {dimension_semantics = [#tpu.dimension_semantics<parallel>], iteration_bounds = array<i64: 2>, scalar_prefetch = 0 : i64, scratch_operands = 0 : i64, tpu.core_type = #tpu.core_type<tc>, window_params = [{transform_indices = @transform_0, window_bounds = array<i64: 64, 16>}, {transform_indices = @transform_1, window_bounds = array<i64: 64, 8>}, {transform_indices = @transform_2, window_bounds = array<i64: 64, 32>}, {transform_indices = @transform_3, window_bounds = array<i64: 64, 56>}]} {
    %c0 = arith.constant 0 : index
    %c0_0 = arith.constant 0 : index
    %0 = vector.load %arg1[%c0, %c0_0] : memref<64x16xf32, #tpu.memory_space<vmem>>, vector<64x16xf32>
    %c0_1 = arith.constant 0 : index
    %c0_2 = arith.constant 0 : index
    %1 = vector.load %arg2[%c0_1, %c0_2] : memref<64x8xf32, #tpu.memory_space<vmem>>, vector<64x8xf32>
    %c0_3 = arith.constant 0 : index
    %c0_4 = arith.constant 0 : index
    %2 = vector.load %arg3[%c0_3, %c0_4] : memref<64x32xf32, #tpu.memory_space<vmem>>, vector<64x32xf32>
    %3 = tpu.concatenate %0, %1, %2 in 1 : vector<64x16xf32>, vector<64x8xf32>, vector<64x32xf32> -> vector<64x56xf32>
    %c0_5 = arith.constant 0 : index
    %c0_6 = arith.constant 0 : index
    %4 = vector.load %arg4[%c0_5, %c0_6] : memref<64x56xf32, #tpu.memory_space<vmem>>, vector<64x56xf32>
    tpu.vector_store %arg4[%c0_5, %c0_6], %3 {strides = array<i32>} : memref<64x56xf32, #tpu.memory_space<vmem>>, vector<64x56xf32>,
    return
  }
  func.func @transform_0(%arg0: i32) -> (i32, i32) {
    %c0_i32 = arith.constant 0 : i32
    %c0_i32_0 = arith.constant 0 : i32
    return %arg0, %c0_i32 : i32, i32
  }
  func.func @transform_1(%arg0: i32) -> (i32, i32) {
    %c0_i32 = arith.constant 0 : i32
    %c0_i32_0 = arith.constant 0 : i32
    return %arg0, %c0_i32 : i32, i32
  }
  func.func @transform_2(%arg0: i32) -> (i32, i32) {
    %c0_i32 = arith.constant 0 : i32
    %c0_i32_0 = arith.constant 0 : i32
    return %arg0, %c0_i32 : i32, i32
  }
  func.func @transform_3(%arg0: i32) -> (i32, i32) {
    %c0_i32 = arith.constant 0 : i32
    %c0_i32_0 = arith.constant 0 : i32
    return %arg0, %c0_i32 : i32, i32
  }
}

</mosaic_0001>

<bundles_post_ra>
// kernel: tpu_custom_call.1
= control target key start
LH: loop header
LB: loop body
LE: loop exit
PB: predicated region body
PF: predicated region fallthrough
CT: control target
= control target key end

     0   :  { %s468_s12 = smov 0   ;;  %s541_s0 = inlined_call_operand.vmem [shape: f32[128,16], index: 0, kind: input, shape index: {}]   ;;  %s542_s1 = inlined_call_operand.vmem [shape: f32[128,8], index: 1, kind: input, shape index: {}]   ;;  %s543_s2 = inlined_call_operand.vmem [shape: f32[128,32], index: 2, kind: input, shape index: {}]   ;;  %s544_s3 = inlined_call_operand.vmem [shape: f32[128,56], index: 3, kind: output, shape index: {}]  }
   0x1 LB: > { %s413_s13 = sadd.s32 4294967295, %s444_s12   ;;  %p417_p0 = scmp.ge.s32.totalorder %s444_s12, 1  ;;  %s444_s12 = sphi %s468_s12, %s13_s12  }
   0x2   : > { %p160_p1 = scmp.lt.s32.totalorder %s444_s12, 3 }
   0x4   : > { %p161_p2 = pnand %p417_p0, %p160_p1 }
   0x5   : > { %s418_s14 = sshll.u32 (!%p161_p2), %s413_s13, 3  ;;  %s446_s19 = smov (!%p161_p2), 16  }
   0x6   : > { %164 = sbr.rel (%p161_p2) target bundleno = 160 (0xa0), region = 32  ;;  %p195_p3 = scmp.lt.s32.totalorder (!%p161_p2), %s418_s14, 15 }
   0x7   : > { %s447_s23 = smov (!%p161_p2), 24  }
   0xb   : > { %s546_s14 = smov (!%p195_p3, %s418_s14), 15  ;;  %vm306_vm0 = vcmask 130048   ;;  %vm315_vm1 = vcmask 195584   ;;  %vm324_vm2 = vcmask 457728  }
   0xc   : > { %s476_s15 = sshll.u32 %s546_s14, 3 }
   0xd   : > { %s204_s18 = scalar_lea.vmem %s542_s1, %s476_s15  ;;  %s210_s22 = scalar_lea.vmem %s543_s2, %s476_s15 }
   0xe   : > { %v228_v0 = vld [vmem:[%s204_s18 + $0x10] sm:$0xff]  ;;  %v226_v1 = vld [vmem:[%s204_s18] sm:$0xff]  ;;  %v229_v2 = vld [vmem:[%s204_s18 + $0x18] sm:$0xff]  ;;  %s490_s26 = scalar_lea.vmem %s541_s0, %s476_s15  ;;  %s498_s29 = scalar_lea.vmem %s544_s3, %s476_s15 }
   0xf   : > { %254 = vrot.lane.b32.xlu1 %v228_v0, %s446_s19  ;;  %250 = vrot.lane.b32.xlu0 %v226_v1, %s446_s19  ;;  %v227_v3 = vld [vmem:[%s204_s18 + $0x8] sm:$0xff]  ;;  %v230_v5 = vld [vmem:[%s204_s18 + $0x20] sm:$0xff] }
  0x10   : > { %v231_v4 = vld [vmem:[%s204_s18 + $0x28] sm:$0xff]  ;;  %v233_v6 = vld [vmem:[%s204_s18 + $0x38] sm:$0xff]  ;;  %v232_v7 = vld [vmem:[%s204_s18 + $0x30] sm:$0xff] }
  0x11   : > { %v235_v8 = vld [vmem:[%s210_s22 + $0x8] sm:$0xff]  ;;  %v234_v9 = vld [vmem:[%s210_s22] sm:$0xff]  ;;  %v237_v10 = vld [vmem:[%s210_s22 + $0x18] sm:$0xff] }
  0x12   : > { %v236_v11 = vld [vmem:[%s210_s22 + $0x10] sm:$0xff]  ;;  %v239_v12 = vld [vmem:[%s210_s22 + $0x28] sm:$0xff]  ;;  %v238_v13 = vld [vmem:[%s210_s22 + $0x20] sm:$0xff] }
  0x13   : > { %256 = vrot.lane.b32.xlu1 %v229_v2, %s446_s19  ;;  %252 = vrot.lane.b32.xlu0 %v227_v3, %s446_s19  ;;  %v241_v14 = vld [vmem:[%s210_s22 + $0x38] sm:$0xff]  ;;  %v240_v15 = vld [vmem:[%s210_s22 + $0x30] sm:$0xff] }
  0x14   : > { %v218_v24 = vld [vmem:[%s490_s26] sm:$0xff]  ;;  %v219_v25 = vld [vmem:[%s490_s26 + $0x8] sm:$0xff]  ;;  %v220_v30 = vld [vmem:[%s490_s26 + $0x10] sm:$0xff] }
  0x15   : > { %v221_v31 = vld [vmem:[%s490_s26 + $0x18] sm:$0xff]  ;;  %v223_v38 = vld [vmem:[%s490_s26 + $0x28] sm:$0xff]  ;;  %v222_v39 = vld [vmem:[%s490_s26 + $0x20] sm:$0xff] }
  0x16   : > { %v225_v46 = vld [vmem:[%s490_s26 + $0x38] sm:$0xff]  ;;  %v224_v47 = vld [vmem:[%s490_s26 + $0x30] sm:$0xff] }
  0x17   : > { %260 = vrot.lane.b32.xlu1 %v231_v4, %s446_s19  ;;  %258 = vrot.lane.b32.xlu0 %v230_v5, %s446_s19 }
  0x1b   : > { %264 = vrot.lane.b32.xlu1 %v233_v6, %s446_s19  ;;  %262 = vrot.lane.b32.xlu0 %v232_v7, %s446_s19 }
  0x1f   : > { %284 = vrot.lane.b32.xlu1 %v235_v8, %s447_s23  ;;  %282 = vrot.lane.b32.xlu0 %v234_v9, %s447_s23 }
  0x23   : > { %288 = vrot.lane.b32.xlu1 %v237_v10, %s447_s23  ;;  %286 = vrot.lane.b32.xlu0 %v236_v11, %s447_s23 }
  0x27   : > { %292 = vrot.lane.b32.xlu1 %v239_v12, %s447_s23  ;;  %290 = vrot.lane.b32.xlu0 %v238_v13, %s447_s23 }
  0x2b   : > { %296 = vrot.lane.b32.xlu1 %v241_v14, %s447_s23  ;;  %294 = vrot.lane.b32.xlu0 %v240_v15, %s447_s23 }
  0x81   : > { %v255_v16 = vpop.permute.xlu1 %254  ;;  %v251_v17 = vpop.permute.xlu0 %250 }
  0x82   : > { %v307_v26 = vsel %vm306_vm0, %v218_v24, %v251_v17  ;;  %v309_v34 = vsel %vm306_vm0, %v220_v30, %v255_v16 }
  0x85   : > { %v257_v18 = vpop.permute.xlu1 %256  ;;  %v253_v19 = vpop.permute.xlu0 %252 }
  0x86   : > { %v308_v27 = vsel %vm306_vm0, %v219_v25, %v253_v19  ;;  %v310_v35 = vsel %vm306_vm0, %v221_v31, %v257_v18 }
  0x89   : > { %v261_v20 = vpop.permute.xlu1 %260  ;;  %v259_v21 = vpop.permute.xlu0 %258 }
  0x8a   : > { %v312_v42 = vsel %vm306_vm0, %v223_v38, %v261_v20  ;;  %v311_v43 = vsel %vm306_vm0, %v222_v39, %v259_v21 }
  0x8d   : > { %v265_v22 = vpop.permute.xlu1 %264  ;;  %v263_v23 = vpop.permute.xlu0 %262 }
  0x8e   : > { %v314_v50 = vsel %vm306_vm0, %v225_v46, %v265_v22  ;;  %v313_v51 = vsel %vm306_vm0, %v224_v47, %v263_v23 }
  0x91   : > { %v285_v28 = vpop.permute.xlu1 %284  ;;  %v283_v29 = vpop.permute.xlu0 %282 }
  0x92   : > { %v317_v32 = vsel %vm315_vm1, %v308_v27, %v285_v28  ;;  %v316_v33 = vsel %vm315_vm1, %v307_v26, %v283_v29 }
  0x93   : > { %326 = vst.msk [vmem:[%s498_s29 + $0x8] sm:$0xff] %vm324_vm2, %v317_v32  ;;  %325 = vst.msk [vmem:[%s498_s29] sm:$0xff] %vm324_vm2, %v316_v33 }
  0x95   : > { %v289_v36 = vpop.permute.xlu1 %288  ;;  %v287_v37 = vpop.permute.xlu0 %286 }
  0x96   : > { %v319_v40 = vsel %vm315_vm1, %v310_v35, %v289_v36  ;;  %v318_v41 = vsel %vm315_vm1, %v309_v34, %v287_v37 }
  0x97   : > { %328 = vst.msk [vmem:[%s498_s29 + $0x18] sm:$0xff] %vm324_vm2, %v319_v40  ;;  %327 = vst.msk [vmem:[%s498_s29 + $0x10] sm:$0xff] %vm324_vm2, %v318_v41 }
  0x99   : > { %v293_v44 = vpop.permute.xlu1 %292  ;;  %v291_v45 = vpop.permute.xlu0 %290 }
  0x9a   : > { %v321_v48 = vsel %vm315_vm1, %v312_v42, %v293_v44  ;;  %v320_v49 = vsel %vm315_vm1, %v311_v43, %v291_v45 }
  0x9b   : > { %330 = vst.msk [vmem:[%s498_s29 + $0x28] sm:$0xff] %vm324_vm2, %v321_v48  ;;  %329 = vst.msk [vmem:[%s498_s29 + $0x20] sm:$0xff] %vm324_vm2, %v320_v49 }
  0x9d   : > { %v297_v52 = vpop.permute.xlu1 %296  ;;  %v295_v53 = vpop.permute.xlu0 %294 }
  0x9e   : > { %v323_v54 = vsel %vm315_vm1, %v314_v50, %v297_v52  ;;  %v322_v55 = vsel %vm315_vm1, %v313_v51, %v295_v53 }
  0x9f   : > { %332 = vst.msk [vmem:[%s498_s29 + $0x38] sm:$0xff] %vm324_vm2, %v323_v54  ;;  %331 = vst.msk [vmem:[%s498_s29 + $0x30] sm:$0xff] %vm324_vm2, %v322_v55 }
  0xa0 PF: > { %s13_s12 = sadd.s32 1, %s444_s12  }
  0xa1   : > { %p10_p4 = scmp.ge.s32.totalorder %s13_s12, 4  }
  0xa3   :  { %12 = sbr.rel (!%p10_p4) target bundleno = 1 (0x1), region = 68 }

</bundles_post_ra>
